<compile_context>
chip_gen: v5e
topology: v5e:2x2
jax: 0.10.0
libtpu: 0.0.40
codegen_flags: <defaults>
</compile_context>

<pallas_src>
import jax
import jax.numpy as jnp
from jax.experimental import pallas as pl
from jax.experimental.pallas import tpu as pltpu

LANES = 512          # last dim multiple of 128 -> full-lane, unmasked stores
ROWS_PER_TILE = 256  # (256, 512) f32 tile = 512 KiB per buffer


def stupid_model_kernel(params_ref, x_ref, o_ref):
    # params_ref: (1, 2) SMEM holding the pre-fused affine coefficients [a, c]
    #   a = w1 * w2,  c = b1 * w2 + b2   =>   fc2(fc1(x)) == x * a + c
    a = params_ref[0, 0]
    c = params_ref[0, 1]
    o_ref[...] = x_ref[...] * a + c


def stupid_model(x, w1, b1, w2, b2):
    """x: (B, 1) f32; w*, b*: (1, 1) f32 scalars. Returns (B, 1) f32 == fc2(fc1(x))."""
    B = x.shape[0]
    dtype = x.dtype

    # Fold the two Linear(1,1) layers into a single affine map.
    a = (w1[0, 0] * w2[0, 0]).astype(dtype)
    c = (b1[0, 0] * w2[0, 0] + b2[0, 0]).astype(dtype)
    params = jnp.stack([a, c]).reshape(1, 2)

    # Lane-dense layout: flatten, pad to whole tiles, reshape to (rows, LANES).
    tile_elems = ROWS_PER_TILE * LANES
    padded = pl.cdiv(B, tile_elems) * tile_elems
    x_flat = x.reshape(B)
    if padded != B:
        x_flat = jnp.pad(x_flat, (0, padded - B))
    rows = padded // LANES
    x2d = x_flat.reshape(rows, LANES)

    out2d = pl.pallas_call(
        stupid_model_kernel,
        out_shape=jax.ShapeDtypeStruct((rows, LANES), dtype),
        grid=(rows // ROWS_PER_TILE,),
        in_specs=[
            pl.BlockSpec(memory_space=pltpu.MemorySpace.SMEM),        # fused [a, c]
            pl.BlockSpec((ROWS_PER_TILE, LANES), lambda i: (i, 0)),   # x tile
        ],
        out_specs=pl.BlockSpec((ROWS_PER_TILE, LANES), lambda i: (i, 0)),
        compiler_params=pltpu.CompilerParams(
            dimension_semantics=("parallel",),     # shard rows across TCs on v7x
            vmem_limit_bytes=32 * 1024 * 1024,     # explicit, v7x-safe budget
        ),
    )(params, x2d)

    # Drop padding and restore the PyTorch (B, 1) layout.
    return out2d.reshape(padded)[:B].reshape(B, 1)


if __name__ == "__main__":
    key = jax.random.PRNGKey(0)
    kx, k1, k2, k3, k4 = jax.random.split(key, 5)

    B = 8  # batch
    x = jax.random.normal(kx, (B, 1), dtype=jnp.float32)

    # nn.Linear(1, 1) parameters: weight (1, 1), bias stored as (1, 1) scalar.
    w1 = jax.random.uniform(k1, (1, 1), jnp.float32, minval=-1.0, maxval=1.0)
    b1 = jax.random.uniform(k2, (1, 1), jnp.float32, minval=-1.0, maxval=1.0)
    w2 = jax.random.uniform(k3, (1, 1), jnp.float32, minval=-1.0, maxval=1.0)
    b2 = jax.random.uniform(k4, (1, 1), jnp.float32, minval=-1.0, maxval=1.0)

    out = stupid_model(x, w1, b1, w2, b2)
    out = jax.block_until_ready(out)

    # Pure-JAX reference of the unfused PyTorch forward: fc2(fc1(x)).
    # (Kernel uses the fused form; rounding differs only at ~1 ulp.)
    ref = (x * w1[0, 0] + b1[0, 0]) * w2[0, 0] + b2[0, 0]
    assert out.shape == (B, 1)
    assert jnp.allclose(out, ref, atol=1e-5, rtol=1e-5)

    print("KERNEL_OK")
</pallas_src>

<mosaic_0001>
module attributes {stable_mosaic.version = 11 : i64} {
  func.func @stupid_model_kernel(%arg0: i32, %arg1: memref<1x2xf32, #tpu.memory_space<smem>>, %arg2: memref<256x512xf32, #tpu.memory_space<vmem>>, %arg3: memref<256x512xf32, #tpu.memory_space<vmem>>) attributes {dimension_semantics = [#tpu.dimension_semantics<parallel>], iteration_bounds = array<i64: 1>, scalar_prefetch = 0 : i64, scratch_operands = 0 : i64, tpu.core_type = #tpu.core_type<tc>, window_params = [{transform_indices = @transform_0, window_bounds = array<i64: 1, 2>}, {transform_indices = @transform_1, window_bounds = array<i64: 256, 512>}, {transform_indices = @transform_2, window_bounds = array<i64: 256, 512>}]} {
    %c0 = arith.constant 0 : index
    %c0_0 = arith.constant 0 : index
    %0 = memref.load %arg1[%c0, %c0_0] : memref<1x2xf32, #tpu.memory_space<smem>>
    %c0_1 = arith.constant 0 : index
    %c1 = arith.constant 1 : index
    %1 = memref.load %arg1[%c0_1, %c1] : memref<1x2xf32, #tpu.memory_space<smem>>
    %c0_2 = arith.constant 0 : index
    %c0_3 = arith.constant 0 : index
    %2 = vector.load %arg2[%c0_2, %c0_3] : memref<256x512xf32, #tpu.memory_space<vmem>>, vector<256x512xf32>
    %3 = vector.broadcast %0 : f32 to vector<256x512xf32>
    %4 = arith.mulf %2, %3 : vector<256x512xf32>
    %5 = vector.broadcast %1 : f32 to vector<256x512xf32>
    %6 = arith.addf %4, %5 : vector<256x512xf32>
    %c0_4 = arith.constant 0 : index
    %c0_5 = arith.constant 0 : index
    %7 = vector.load %arg3[%c0_4, %c0_5] : memref<256x512xf32, #tpu.memory_space<vmem>>, vector<256x512xf32>
    tpu.vector_store %arg3[%c0_4, %c0_5], %6 {strides = array<i32>} : memref<256x512xf32, #tpu.memory_space<vmem>>, vector<256x512xf32>,
    return
  }
  func.func @transform_0(%arg0: i32) -> (i32, i32) {
    %c0_i32 = arith.constant 0 : i32
    %c0_i32_0 = arith.constant 0 : i32
    %c0_i32_1 = arith.constant 0 : i32
    return %c0_i32, %c0_i32_0 : i32, i32
  }
  func.func @transform_1(%arg0: i32) -> (i32, i32) {
    %c0_i32 = arith.constant 0 : i32
    %c0_i32_0 = arith.constant 0 : i32
    return %arg0, %c0_i32 : i32, i32
  }
  func.func @transform_2(%arg0: i32) -> (i32, i32) {
    %c0_i32 = arith.constant 0 : i32
    %c0_i32_0 = arith.constant 0 : i32
    return %arg0, %c0_i32 : i32, i32
  }
}

</mosaic_0001>

<bundles_post_ra>
// kernel: tpu_custom_call.1
= control target key start
LH: loop header
LB: loop body
LE: loop exit
PB: predicated region body
PF: predicated region fallthrough
CT: control target
= control target key end

     0   :  { %7 = vsyncpa [#allocation5], 0  ;;  %s944_s0 = inlined_call_operand.hbm [shape: f32[1,2], index: 0, kind: input, shape index: {}]   ;;  %s945_s1 = inlined_call_operand.hbm [shape: f32[256,512], index: 1, kind: input, shape index: {}]   ;;  %s946_s2 = inlined_call_operand.hbm [shape: f32[256,512], index: 2, kind: output, shape index: {}]  }
   0x1   :  { %8 = vsyncpa [#allocation3], 0 }
   0x2   :  { %9 = vsyncpa [#allocation4], 0  ;;  %s15_s11 = sshll.u32 %s944_s0, 4  ;;  %s23_s14 = sshll.u32 %s945_s1, 4  ;;  %s16_s11 = int_to_ptr.hbm [resolvable:$true] %s15_s11  ;;  %s24_s14 = int_to_ptr.hbm [resolvable:$true] %s23_s14 }
   0x3   :  { %s649_s15 = smov [#allocation2]   ;;  %s650_s16 = smov [#allocation6]  }
   0x4   :  { %18 = dma.hbm_to_smem %s16_s11, 16, %s649_s15, [#allocation5]  }
   0x5   :  { %s25_s17 = sshll.u32 %s650_s16, 4  ;;  %s651_s18 = smov 512   ;;  %s26_s17 = int_to_ptr.vmem [resolvable:$true] %s25_s17 }
   0x6   :  { %s652_s19 = smov 32  }
   0x7   :  { %31 = dma.hbm_to_vmem [thread:$0]  %s24_s14, 16384, %s26_s17, [#allocation3], %s651_s18, %s651_s18, %s652_s19  }
   0x8   :  { %643 = dma.done.wait [#allocation5], 16  }
   0x9   :  { %644 = vsyncadd [#allocation5], 4294967280 }
   0xa   :  { %645 = dma.done.wait [#allocation3], 16384  }
   0xb   :  { %646 = vsyncadd [#allocation3], 4294950912 }
   0xc   :  { %40 = sfence }
   0xd   :  { %s41_s0 = sld [smem:[#allocation2]]  ;;  %v43_v0 = vld [vmem:[#allocation6] sm:$0xff]  ;;  %v44_v1 = vld [vmem:[#allocation6 + $0x8] sm:$0xff]  ;;  %v45_v2 = vld [vmem:[#allocation6 + $0x10] sm:$0xff]  ;;  %s653_s1 = smov [#allocation7]  }
   0xe   :  { %s577_s20 = sld [smem:[#allocation2 + $0x1]]  ;;  %v46_v3 = vld [vmem:[#allocation6 + $0x18] sm:$0xff]  ;;  %v47_v4 = vld [vmem:[#allocation6 + $0x20] sm:$0xff]  ;;  %v48_v5 = vld [vmem:[#allocation6 + $0x28] sm:$0xff]  ;;  %s561_s21 = sshll.u32 %s653_s1, 4  ;;  %s562_s21 = int_to_ptr.vmem [resolvable:$true] %s561_s21 }
   0xf   :  { %v49_v7 = vld [vmem:[#allocation6 + $0x30] sm:$0xff]  ;;  %v50_v12 = vld [vmem:[#allocation6 + $0x38] sm:$0xff]  ;;  %v51_v16 = vld [vmem:[#allocation6 + $0x40] sm:$0xff]  ;;  %s563_s24 = sshll.u32 %s946_s2, 4  ;;  %s564_s24 = int_to_ptr.hbm [resolvable:$true] %s563_s24 }
  0x10   :  { %v52_v21 = vld [vmem:[#allocation6 + $0x48] sm:$0xff]  ;;  %v53_v24 = vld [vmem:[#allocation6 + $0x50] sm:$0xff]  ;;  %v54_v27 = vld [vmem:[#allocation6 + $0x58] sm:$0xff] }
  0x11   :  { %v55_v30 = vld [vmem:[#allocation6 + $0x60] sm:$0xff]  ;;  %v56_v33 = vld [vmem:[#allocation6 + $0x68] sm:$0xff]  ;;  %v57_v36 = vld [vmem:[#allocation6 + $0x70] sm:$0xff] }
  0x12   :  { %v58_v39 = vld [vmem:[#allocation6 + $0x78] sm:$0xff]  ;;  %v59_v42 = vld [vmem:[#allocation6 + $0x80] sm:$0xff]  ;;  %v60_v45 = vld [vmem:[#allocation6 + $0x88] sm:$0xff] }
  0x13   :  { %v678_v6 = vstv %s41_s0  ;;  %v61_v48 = vld [vmem:[#allocation6 + $0x90] sm:$0xff]  ;;  %v62_v51 = vld [vmem:[#allocation6 + $0x98] sm:$0xff]  ;;  %v63_v54 = vld [vmem:[#allocation6 + $0xa0] sm:$0xff] }
  0x14   :  { %v172_v8 = vmul.f32 %v678_v6, %v43_v0  ;;  %v681_v9 = vstv %s577_s20  ;;  %v173_v10 = vmul.f32 %v678_v6, %v44_v1  ;;  %v174_v11 = vmul.f32 %v678_v6, %v45_v2  ;;  %v64_v57 = vld [vmem:[#allocation6 + $0xa8] sm:$0xff]  ;;  %v65_v60 = vld [vmem:[#allocation6 + $0xb0] sm:$0xff]  ;;  %v66_v63 = vld [vmem:[#allocation6 + $0xb8] sm:$0xff] }
  0x15   :  { %v175_v13 = vmul.f32 %v678_v6, %v46_v3  ;;  %v176_v14 = vmul.f32 %v678_v6, %v47_v4  ;;  %v177_v15 = vmul.f32 %v678_v6, %v48_v5  ;;  %v178_v20 = vmul.f32 %v678_v6, %v49_v7  ;;  %v67_v2 = vld [vmem:[#allocation6 + $0xc0] sm:$0xff]  ;;  %v68_v5 = vld [vmem:[#allocation6 + $0xc8] sm:$0xff] }
  0x16   :  { %v301_v17 = vadd.f32 %v681_v9, %v172_v8  ;;  %v302_v18 = vadd.f32 %v681_v9, %v173_v10  ;;  %v303_v19 = vadd.f32 %v681_v9, %v174_v11  ;;  %v179_v23 = vmul.f32 %v678_v6, %v50_v12  ;;  %v69_v10 = vld [vmem:[#allocation6 + $0xd0] sm:$0xff] }
  0x17   :  { %v304_v22 = vadd.f32 %v681_v9, %v175_v13  ;;  %v305_v25 = vadd.f32 %v681_v9, %v176_v14  ;;  %v180_v26 = vmul.f32 %v678_v6, %v51_v16  ;;  %v306_v28 = vadd.f32 %v681_v9, %v177_v15  ;;  %v70_v13 = vld [vmem:[#allocation6 + $0xd8] sm:$0xff]  ;;  %v71_v16 = vld [vmem:[#allocation6 + $0xe0] sm:$0xff] }
  0x18   :  { %429 = vst [vmem:[#allocation7] sm:$0xff] %v301_v17  ;;  %v181_v29 = vmul.f32 %v678_v6, %v52_v21  ;;  %v307_v31 = vadd.f32 %v681_v9, %v178_v20  ;;  %v182_v32 = vmul.f32 %v678_v6, %v53_v24  ;;  %v308_v34 = vadd.f32 %v681_v9, %v179_v23 }
  0x19   :  { %430 = vst [vmem:[#allocation7 + $0x8] sm:$0xff] %v302_v18  ;;  %v183_v35 = vmul.f32 %v678_v6, %v54_v27  ;;  %v309_v37 = vadd.f32 %v681_v9, %v180_v26  ;;  %v184_v38 = vmul.f32 %v678_v6, %v55_v30  ;;  %v185_v41 = vmul.f32 %v678_v6, %v56_v33 }
  0x1a   :  { %431 = vst [vmem:[#allocation7 + $0x10] sm:$0xff] %v303_v19  ;;  %v310_v40 = vadd.f32 %v681_v9, %v181_v29  ;;  %v311_v43 = vadd.f32 %v681_v9, %v182_v32  ;;  %v186_v44 = vmul.f32 %v678_v6, %v57_v36  ;;  %v187_v47 = vmul.f32 %v678_v6, %v58_v39  ;;  %v72_v19 = vld [vmem:[#allocation6 + $0xe8] sm:$0xff] }
  0x1b   :  { %432 = vst [vmem:[#allocation7 + $0x18] sm:$0xff] %v304_v22  ;;  %v312_v46 = vadd.f32 %v681_v9, %v183_v35  ;;  %v313_v49 = vadd.f32 %v681_v9, %v184_v38  ;;  %v188_v50 = vmul.f32 %v678_v6, %v59_v42  ;;  %v314_v52 = vadd.f32 %v681_v9, %v185_v41  ;;  %v73_v22 = vld [vmem:[#allocation6 + $0xf0] sm:$0xff] }
  0x1c   :  { %433 = vst [vmem:[#allocation7 + $0x20] sm:$0xff] %v305_v25  ;;  %v189_v53 = vmul.f32 %v678_v6, %v60_v45  ;;  %v315_v55 = vadd.f32 %v681_v9, %v186_v44  ;;  %v190_v56 = vmul.f32 %v678_v6, %v61_v48  ;;  %v316_v58 = vadd.f32 %v681_v9, %v187_v47  ;;  %v74_v25 = vld [vmem:[#allocation6 + $0xf8] sm:$0xff] }
  0x1d   :  { %434 = vst [vmem:[#allocation7 + $0x28] sm:$0xff] %v306_v28  ;;  %v191_v59 = vmul.f32 %v678_v6, %v62_v51  ;;  %v317_v61 = vadd.f32 %v681_v9, %v188_v50  ;;  %v192_v62 = vmul.f32 %v678_v6, %v63_v54  ;;  %v193_v1 = vmul.f32 %v678_v6, %v64_v57  ;;  %v75_v28 = vld [vmem:[#allocation6 + $0x100] sm:$0xff] }
  0x1e   :  { %435 = vst [vmem:[#allocation7 + $0x30] sm:$0xff] %v307_v31  ;;  %v318_v0 = vadd.f32 %v681_v9, %v189_v53  ;;  %v319_v3 = vadd.f32 %v681_v9, %v190_v56  ;;  %v194_v4 = vmul.f32 %v678_v6, %v65_v60  ;;  %v195_v8 = vmul.f32 %v678_v6, %v66_v63  ;;  %v76_v31 = vld [vmem:[#allocation6 + $0x108] sm:$0xff] }
  0x1f   :  { %436 = vst [vmem:[#allocation7 + $0x38] sm:$0xff] %v308_v34  ;;  %v320_v7 = vadd.f32 %v681_v9, %v191_v59  ;;  %v321_v11 = vadd.f32 %v681_v9, %v192_v62  ;;  %v196_v12 = vmul.f32 %v678_v6, %v67_v2  ;;  %v322_v14 = vadd.f32 %v681_v9, %v193_v1  ;;  %v77_v34 = vld [vmem:[#allocation6 + $0x110] sm:$0xff] }
  0x20   :  { %437 = vst [vmem:[#allocation7 + $0x40] sm:$0xff] %v309_v37  ;;  %v197_v15 = vmul.f32 %v678_v6, %v68_v5  ;;  %v323_v17 = vadd.f32 %v681_v9, %v194_v4  ;;  %v198_v18 = vmul.f32 %v678_v6, %v69_v10  ;;  %v324_v20 = vadd.f32 %v681_v9, %v195_v8  ;;  %v78_v37 = vld [vmem:[#allocation6 + $0x118] sm:$0xff] }
  0x21   :  { %438 = vst [vmem:[#allocation7 + $0x48] sm:$0xff] %v310_v40  ;;  %v199_v21 = vmul.f32 %v678_v6, %v70_v13  ;;  %v325_v23 = vadd.f32 %v681_v9, %v196_v12  ;;  %v200_v24 = vmul.f32 %v678_v6, %v71_v16  ;;  %v201_v27 = vmul.f32 %v678_v6, %v72_v19  ;;  %v79_v40 = vld [vmem:[#allocation6 + $0x120] sm:$0xff] }
  0x22   :  { %439 = vst [vmem:[#allocation7 + $0x50] sm:$0xff] %v311_v43  ;;  %v326_v26 = vadd.f32 %v681_v9, %v197_v15  ;;  %v327_v29 = vadd.f32 %v681_v9, %v198_v18  ;;  %v202_v30 = vmul.f32 %v678_v6, %v73_v22  ;;  %v203_v33 = vmul.f32 %v678_v6, %v74_v25  ;;  %v80_v43 = vld [vmem:[#allocation6 + $0x128] sm:$0xff] }
  0x23   :  { %440 = vst [vmem:[#allocation7 + $0x58] sm:$0xff] %v312_v46  ;;  %v328_v32 = vadd.f32 %v681_v9, %v199_v21  ;;  %v329_v35 = vadd.f32 %v681_v9, %v200_v24  ;;  %v204_v36 = vmul.f32 %v678_v6, %v75_v28  ;;  %v330_v38 = vadd.f32 %v681_v9, %v201_v27  ;;  %v81_v46 = vld [vmem:[#allocation6 + $0x130] sm:$0xff] }
  0x24   :  { %441 = vst [vmem:[#allocation7 + $0x60] sm:$0xff] %v313_v49  ;;  %v205_v39 = vmul.f32 %v678_v6, %v76_v31  ;;  %v331_v41 = vadd.f32 %v681_v9, %v202_v30  ;;  %v206_v42 = vmul.f32 %v678_v6, %v77_v34  ;;  %v332_v44 = vadd.f32 %v681_v9, %v203_v33  ;;  %v82_v49 = vld [vmem:[#allocation6 + $0x138] sm:$0xff] }
  0x25   :  { %442 = vst [vmem:[#allocation7 + $0x68] sm:$0xff] %v314_v52  ;;  %v207_v45 = vmul.f32 %v678_v6, %v78_v37  ;;  %v333_v47 = vadd.f32 %v681_v9, %v204_v36  ;;  %v208_v48 = vmul.f32 %v678_v6, %v79_v40  ;;  %v209_v51 = vmul.f32 %v678_v6, %v80_v43  ;;  %v83_v52 = vld [vmem:[#allocation6 + $0x140] sm:$0xff] }
  0x26   :  { %443 = vst [vmem:[#allocation7 + $0x70] sm:$0xff] %v315_v55  ;;  %v334_v50 = vadd.f32 %v681_v9, %v205_v39  ;;  %v335_v53 = vadd.f32 %v681_v9, %v206_v42  ;;  %v210_v54 = vmul.f32 %v678_v6, %v81_v46  ;;  %v84_v55 = vld [vmem:[#allocation6 + $0x148] sm:$0xff]  ;;  %v211_v57 = vmul.f32 %v678_v6, %v82_v49 }
  0x27   :  { %444 = vst [vmem:[#allocation7 + $0x78] sm:$0xff] %v316_v58  ;;  %v336_v56 = vadd.f32 %v681_v9, %v207_v45  ;;  %v85_v58 = vld [vmem:[#allocation6 + $0x150] sm:$0xff]  ;;  %v337_v59 = vadd.f32 %v681_v9, %v208_v48  ;;  %v212_v60 = vmul.f32 %v678_v6, %v83_v52  ;;  %v338_v62 = vadd.f32 %v681_v9, %v209_v51 }
  0x28   :  { %445 = vst [vmem:[#allocation7 + $0x80] sm:$0xff] %v317_v61  ;;  %v86_v61 = vld [vmem:[#allocation6 + $0x158] sm:$0xff]  ;;  %v213_v63 = vmul.f32 %v678_v6, %v84_v55  ;;  %v339_v1 = vadd.f32 %v681_v9, %v210_v54  ;;  %v214_v2 = vmul.f32 %v678_v6, %v85_v58  ;;  %v340_v4 = vadd.f32 %v681_v9, %v211_v57 }
  0x29   :  { %446 = vst [vmem:[#allocation7 + $0x88] sm:$0xff] %v318_v0  ;;  %v87_v0 = vld [vmem:[#allocation6 + $0x160] sm:$0xff]  ;;  %v215_v5 = vmul.f32 %v678_v6, %v86_v61  ;;  %v341_v8 = vadd.f32 %v681_v9, %v212_v60 }
  0x2a   :  { %447 = vst [vmem:[#allocation7 + $0x90] sm:$0xff] %v319_v3  ;;  %v88_v3 = vld [vmem:[#allocation6 + $0x168] sm:$0xff]  ;;  %v216_v10 = vmul.f32 %v678_v6, %v87_v0  ;;  %v342_v12 = vadd.f32 %v681_v9, %v213_v63  ;;  %v343_v15 = vadd.f32 %v681_v9, %v214_v2 }
  0x2b   :  { %448 = vst [vmem:[#allocation7 + $0x98] sm:$0xff] %v320_v7  ;;  %v89_v7 = vld [vmem:[#allocation6 + $0x170] sm:$0xff]  ;;  %v217_v13 = vmul.f32 %v678_v6, %v88_v3  ;;  %v344_v18 = vadd.f32 %v681_v9, %v215_v5 }
  0x2c   :  { %449 = vst [vmem:[#allocation7 + $0xa0] sm:$0xff] %v321_v11  ;;  %v90_v11 = vld [vmem:[#allocation6 + $0x178] sm:$0xff]  ;;  %v218_v16 = vmul.f32 %v678_v6, %v89_v7  ;;  %v345_v21 = vadd.f32 %v681_v9, %v216_v10 }
  0x2d   :  { %450 = vst [vmem:[#allocation7 + $0xa8] sm:$0xff] %v322_v14  ;;  %v91_v14 = vld [vmem:[#allocation6 + $0x180] sm:$0xff]  ;;  %v219_v19 = vmul.f32 %v678_v6, %v90_v11  ;;  %v346_v24 = vadd.f32 %v681_v9, %v217_v13 }
  0x2e   :  { %451 = vst [vmem:[#allocation7 + $0xb0] sm:$0xff] %v323_v17  ;;  %v92_v17 = vld [vmem:[#allocation6 + $0x188] sm:$0xff]  ;;  %v220_v22 = vmul.f32 %v678_v6, %v91_v14  ;;  %v347_v27 = vadd.f32 %v681_v9, %v218_v16 }
  0x2f   :  { %452 = vst [vmem:[#allocation7 + $0xb8] sm:$0xff] %v324_v20  ;;  %v93_v20 = vld [vmem:[#allocation6 + $0x190] sm:$0xff]  ;;  %v221_v25 = vmul.f32 %v678_v6, %v92_v17  ;;  %v348_v30 = vadd.f32 %v681_v9, %v219_v19 }
  0x30   :  { %453 = vst [vmem:[#allocation7 + $0xc0] sm:$0xff] %v325_v23  ;;  %v94_v23 = vld [vmem:[#allocation6 + $0x198] sm:$0xff]  ;;  %v222_v28 = vmul.f32 %v678_v6, %v93_v20  ;;  %v349_v33 = vadd.f32 %v681_v9, %v220_v22 }
  0x31   :  { %454 = vst [vmem:[#allocation7 + $0xc8] sm:$0xff] %v326_v26  ;;  %v95_v26 = vld [vmem:[#allocation6 + $0x1a0] sm:$0xff]  ;;  %v223_v31 = vmul.f32 %v678_v6, %v94_v23  ;;  %v350_v36 = vadd.f32 %v681_v9, %v221_v25 }
  0x32   :  { %455 = vst [vmem:[#allocation7 + $0xd0] sm:$0xff] %v327_v29  ;;  %v96_v29 = vld [vmem:[#allocation6 + $0x1a8] sm:$0xff]  ;;  %v224_v34 = vmul.f32 %v678_v6, %v95_v26  ;;  %v351_v39 = vadd.f32 %v681_v9, %v222_v28 }
  0x33   :  { %456 = vst [vmem:[#allocation7 + $0xd8] sm:$0xff] %v328_v32  ;;  %v97_v32 = vld [vmem:[#allocation6 + $0x1b0] sm:$0xff]  ;;  %v225_v37 = vmul.f32 %v678_v6, %v96_v29  ;;  %v352_v42 = vadd.f32 %v681_v9, %v223_v31 }
  0x34   :  { %457 = vst [vmem:[#allocation7 + $0xe0] sm:$0xff] %v329_v35  ;;  %v98_v35 = vld [vmem:[#allocation6 + $0x1b8] sm:$0xff]  ;;  %v226_v40 = vmul.f32 %v678_v6, %v97_v32  ;;  %v353_v45 = vadd.f32 %v681_v9, %v224_v34 }
  0x35   :  { %458 = vst [vmem:[#allocation7 + $0xe8] sm:$0xff] %v330_v38  ;;  %v99_v38 = vld [vmem:[#allocation6 + $0x1c0] sm:$0xff]  ;;  %v227_v43 = vmul.f32 %v678_v6, %v98_v35  ;;  %v354_v48 = vadd.f32 %v681_v9, %v225_v37 }
  0x36   :  { %459 = vst [vmem:[#allocation7 + $0xf0] sm:$0xff] %v331_v41  ;;  %v100_v41 = vld [vmem:[#allocation6 + $0x1c8] sm:$0xff]  ;;  %v228_v46 = vmul.f32 %v678_v6, %v99_v38  ;;  %v355_v51 = vadd.f32 %v681_v9, %v226_v40 }
  0x37   :  { %460 = vst [vmem:[#allocation7 + $0xf8] sm:$0xff] %v332_v44  ;;  %v101_v44 = vld [vmem:[#allocation6 + $0x1d0] sm:$0xff]  ;;  %v229_v49 = vmul.f32 %v678_v6, %v100_v41  ;;  %v356_v54 = vadd.f32 %v681_v9, %v227_v43 }
  0x38   :  { %461 = vst [vmem:[#allocation7 + $0x100] sm:$0xff] %v333_v47  ;;  %v102_v47 = vld [vmem:[#allocation6 + $0x1d8] sm:$0xff]  ;;  %v230_v52 = vmul.f32 %v678_v6, %v101_v44  ;;  %v357_v57 = vadd.f32 %v681_v9, %v228_v46 }
  0x39   :  { %462 = vst [vmem:[#allocation7 + $0x108] sm:$0xff] %v334_v50  ;;  %v103_v50 = vld [vmem:[#allocation6 + $0x1e0] sm:$0xff]  ;;  %v231_v55 = vmul.f32 %v678_v6, %v102_v47  ;;  %v358_v60 = vadd.f32 %v681_v9, %v229_v49 }
  0x3a   :  { %463 = vst [vmem:[#allocation7 + $0x110] sm:$0xff] %v335_v53  ;;  %v104_v53 = vld [vmem:[#allocation6 + $0x1e8] sm:$0xff]  ;;  %v232_v58 = vmul.f32 %v678_v6, %v103_v50  ;;  %v359_v63 = vadd.f32 %v681_v9, %v230_v52 }
  0x3b   :  { %464 = vst [vmem:[#allocation7 + $0x118] sm:$0xff] %v336_v56  ;;  %v105_v56 = vld [vmem:[#allocation6 + $0x1f0] sm:$0xff]  ;;  %v233_v61 = vmul.f32 %v678_v6, %v104_v53  ;;  %v360_v2 = vadd.f32 %v681_v9, %v231_v55 }
  0x3c   :  { %465 = vst [vmem:[#allocation7 + $0x120] sm:$0xff] %v337_v59  ;;  %v106_v59 = vld [vmem:[#allocation6 + $0x1f8] sm:$0xff]  ;;  %v234_v0 = vmul.f32 %v678_v6, %v105_v56  ;;  %v361_v5 = vadd.f32 %v681_v9, %v232_v58 }
  0x3d   :  { %466 = vst [vmem:[#allocation7 + $0x128] sm:$0xff] %v338_v62  ;;  %v107_v62 = vld [vmem:[#allocation6 + $0x200] sm:$0xff]  ;;  %v235_v3 = vmul.f32 %v678_v6, %v106_v59  ;;  %v362_v10 = vadd.f32 %v681_v9, %v233_v61 }
  0x3e   :  { %467 = vst [vmem:[#allocation7 + $0x130] sm:$0xff] %v339_v1  ;;  %v108_v1 = vld [vmem:[#allocation6 + $0x208] sm:$0xff]  ;;  %v236_v7 = vmul.f32 %v678_v6, %v107_v62  ;;  %v363_v13 = vadd.f32 %v681_v9, %v234_v0 }
  0x3f   :  { %468 = vst [vmem:[#allocation7 + $0x138] sm:$0xff] %v340_v4  ;;  %v109_v4 = vld [vmem:[#allocation6 + $0x210] sm:$0xff]  ;;  %v237_v11 = vmul.f32 %v678_v6, %v108_v1  ;;  %v364_v16 = vadd.f32 %v681_v9, %v235_v3 }
  0x40   :  { %469 = vst [vmem:[#allocation7 + $0x140] sm:$0xff] %v341_v8  ;;  %v110_v8 = vld [vmem:[#allocation6 + $0x218] sm:$0xff]  ;;  %v238_v14 = vmul.f32 %v678_v6, %v109_v4  ;;  %v365_v19 = vadd.f32 %v681_v9, %v236_v7 }
  0x41   :  { %470 = vst [vmem:[#allocation7 + $0x148] sm:$0xff] %v342_v12  ;;  %v111_v12 = vld [vmem:[#allocation6 + $0x220] sm:$0xff]  ;;  %v239_v17 = vmul.f32 %v678_v6, %v110_v8  ;;  %v366_v22 = vadd.f32 %v681_v9, %v237_v11 }
  0x42   :  { %471 = vst [vmem:[#allocation7 + $0x150] sm:$0xff] %v343_v15  ;;  %v112_v15 = vld [vmem:[#allocation6 + $0x228] sm:$0xff]  ;;  %v240_v20 = vmul.f32 %v678_v6, %v111_v12  ;;  %v367_v25 = vadd.f32 %v681_v9, %v238_v14 }
  0x43   :  { %472 = vst [vmem:[#allocation7 + $0x158] sm:$0xff] %v344_v18  ;;  %v113_v18 = vld [vmem:[#allocation6 + $0x230] sm:$0xff]  ;;  %v241_v23 = vmul.f32 %v678_v6, %v112_v15  ;;  %v368_v28 = vadd.f32 %v681_v9, %v239_v17 }
  0x44   :  { %473 = vst [vmem:[#allocation7 + $0x160] sm:$0xff] %v345_v21  ;;  %v114_v21 = vld [vmem:[#allocation6 + $0x238] sm:$0xff]  ;;  %v242_v26 = vmul.f32 %v678_v6, %v113_v18  ;;  %v369_v31 = vadd.f32 %v681_v9, %v240_v20 }
  0x45   :  { %474 = vst [vmem:[#allocation7 + $0x168] sm:$0xff] %v346_v24  ;;  %v115_v24 = vld [vmem:[#allocation6 + $0x240] sm:$0xff]  ;;  %v243_v29 = vmul.f32 %v678_v6, %v114_v21  ;;  %v370_v34 = vadd.f32 %v681_v9, %v241_v23 }
  0x46   :  { %475 = vst [vmem:[#allocation7 + $0x170] sm:$0xff] %v347_v27  ;;  %v116_v27 = vld [vmem:[#allocation6 + $0x248] sm:$0xff]  ;;  %v244_v32 = vmul.f32 %v678_v6, %v115_v24  ;;  %v371_v37 = vadd.f32 %v681_v9, %v242_v26 }
  0x47   :  { %476 = vst [vmem:[#allocation7 + $0x178] sm:$0xff] %v348_v30  ;;  %v117_v30 = vld [vmem:[#allocation6 + $0x250] sm:$0xff]  ;;  %v245_v35 = vmul.f32 %v678_v6, %v116_v27  ;;  %v372_v40 = vadd.f32 %v681_v9, %v243_v29 }
  0x48   :  { %477 = vst [vmem:[#allocation7 + $0x180] sm:$0xff] %v349_v33  ;;  %v118_v33 = vld [vmem:[#allocation6 + $0x258] sm:$0xff]  ;;  %v246_v38 = vmul.f32 %v678_v6, %v117_v30  ;;  %v373_v43 = vadd.f32 %v681_v9, %v244_v32 }
  0x49   :  { %478 = vst [vmem:[#allocation7 + $0x188] sm:$0xff] %v350_v36  ;;  %v119_v36 = vld [vmem:[#allocation6 + $0x260] sm:$0xff]  ;;  %v247_v41 = vmul.f32 %v678_v6, %v118_v33  ;;  %v374_v46 = vadd.f32 %v681_v9, %v245_v35 }
  0x4a   :  { %479 = vst [vmem:[#allocation7 + $0x190] sm:$0xff] %v351_v39  ;;  %v120_v39 = vld [vmem:[#allocation6 + $0x268] sm:$0xff]  ;;  %v248_v44 = vmul.f32 %v678_v6, %v119_v36  ;;  %v375_v49 = vadd.f32 %v681_v9, %v246_v38 }
  0x4b   :  { %480 = vst [vmem:[#allocation7 + $0x198] sm:$0xff] %v352_v42  ;;  %v121_v42 = vld [vmem:[#allocation6 + $0x270] sm:$0xff]  ;;  %v249_v47 = vmul.f32 %v678_v6, %v120_v39  ;;  %v376_v52 = vadd.f32 %v681_v9, %v247_v41 }
  0x4c   :  { %481 = vst [vmem:[#allocation7 + $0x1a0] sm:$0xff] %v353_v45  ;;  %v122_v45 = vld [vmem:[#allocation6 + $0x278] sm:$0xff]  ;;  %v250_v50 = vmul.f32 %v678_v6, %v121_v42  ;;  %v377_v55 = vadd.f32 %v681_v9, %v248_v44 }
  0x4d   :  { %482 = vst [vmem:[#allocation7 + $0x1a8] sm:$0xff] %v354_v48  ;;  %v123_v48 = vld [vmem:[#allocation6 + $0x280] sm:$0xff]  ;;  %v251_v53 = vmul.f32 %v678_v6, %v122_v45  ;;  %v378_v58 = vadd.f32 %v681_v9, %v249_v47 }
  0x4e   :  { %483 = vst [vmem:[#allocation7 + $0x1b0] sm:$0xff] %v355_v51  ;;  %v124_v51 = vld [vmem:[#allocation6 + $0x288] sm:$0xff]  ;;  %v252_v56 = vmul.f32 %v678_v6, %v123_v48  ;;  %v379_v61 = vadd.f32 %v681_v9, %v250_v50 }
  0x4f   :  { %484 = vst [vmem:[#allocation7 + $0x1b8] sm:$0xff] %v356_v54  ;;  %v125_v54 = vld [vmem:[#allocation6 + $0x290] sm:$0xff]  ;;  %v253_v59 = vmul.f32 %v678_v6, %v124_v51  ;;  %v380_v0 = vadd.f32 %v681_v9, %v251_v53 }
  0x50   :  { %485 = vst [vmem:[#allocation7 + $0x1c0] sm:$0xff] %v357_v57  ;;  %v126_v57 = vld [vmem:[#allocation6 + $0x298] sm:$0xff]  ;;  %v254_v62 = vmul.f32 %v678_v6, %v125_v54  ;;  %v381_v3 = vadd.f32 %v681_v9, %v252_v56 }
  0x51   :  { %486 = vst [vmem:[#allocation7 + $0x1c8] sm:$0xff] %v358_v60  ;;  %v127_v60 = vld [vmem:[#allocation6 + $0x2a0] sm:$0xff]  ;;  %v255_v1 = vmul.f32 %v678_v6, %v126_v57  ;;  %v382_v7 = vadd.f32 %v681_v9, %v253_v59 }
  0x52   :  { %487 = vst [vmem:[#allocation7 + $0x1d0] sm:$0xff] %v359_v63  ;;  %v128_v63 = vld [vmem:[#allocation6 + $0x2a8] sm:$0xff]  ;;  %v256_v4 = vmul.f32 %v678_v6, %v127_v60  ;;  %v383_v11 = vadd.f32 %v681_v9, %v254_v62 }
  0x53   :  { %488 = vst [vmem:[#allocation7 + $0x1d8] sm:$0xff] %v360_v2  ;;  %v129_v2 = vld [vmem:[#allocation6 + $0x2b0] sm:$0xff]  ;;  %v257_v8 = vmul.f32 %v678_v6, %v128_v63  ;;  %v384_v14 = vadd.f32 %v681_v9, %v255_v1 }
  0x54   :  { %489 = vst [vmem:[#allocation7 + $0x1e0] sm:$0xff] %v361_v5  ;;  %v130_v5 = vld [vmem:[#allocation6 + $0x2b8] sm:$0xff]  ;;  %v258_v12 = vmul.f32 %v678_v6, %v129_v2  ;;  %v385_v17 = vadd.f32 %v681_v9, %v256_v4 }
  0x55   :  { %490 = vst [vmem:[#allocation7 + $0x1e8] sm:$0xff] %v362_v10  ;;  %v131_v10 = vld [vmem:[#allocation6 + $0x2c0] sm:$0xff]  ;;  %v259_v15 = vmul.f32 %v678_v6, %v130_v5  ;;  %v386_v20 = vadd.f32 %v681_v9, %v257_v8 }
  0x56   :  { %491 = vst [vmem:[#allocation7 + $0x1f0] sm:$0xff] %v363_v13  ;;  %v132_v13 = vld [vmem:[#allocation6 + $0x2c8] sm:$0xff]  ;;  %v260_v18 = vmul.f32 %v678_v6, %v131_v10  ;;  %v387_v23 = vadd.f32 %v681_v9, %v258_v12 }
  0x57   :  { %492 = vst [vmem:[#allocation7 + $0x1f8] sm:$0xff] %v364_v16  ;;  %v133_v16 = vld [vmem:[#allocation6 + $0x2d0] sm:$0xff]  ;;  %v261_v21 = vmul.f32 %v678_v6, %v132_v13  ;;  %v388_v26 = vadd.f32 %v681_v9, %v259_v15 }
  0x58   :  { %493 = vst [vmem:[#allocation7 + $0x200] sm:$0xff] %v365_v19  ;;  %v134_v19 = vld [vmem:[#allocation6 + $0x2d8] sm:$0xff]  ;;  %v262_v24 = vmul.f32 %v678_v6, %v133_v16  ;;  %v389_v29 = vadd.f32 %v681_v9, %v260_v18 }
  0x59   :  { %494 = vst [vmem:[#allocation7 + $0x208] sm:$0xff] %v366_v22  ;;  %v135_v22 = vld [vmem:[#allocation6 + $0x2e0] sm:$0xff]  ;;  %v263_v27 = vmul.f32 %v678_v6, %v134_v19  ;;  %v390_v32 = vadd.f32 %v681_v9, %v261_v21 }
  0x5a   :  { %495 = vst [vmem:[#allocation7 + $0x210] sm:$0xff] %v367_v25  ;;  %v136_v25 = vld [vmem:[#allocation6 + $0x2e8] sm:$0xff]  ;;  %v264_v30 = vmul.f32 %v678_v6, %v135_v22  ;;  %v391_v35 = vadd.f32 %v681_v9, %v262_v24 }
  0x5b   :  { %496 = vst [vmem:[#allocation7 + $0x218] sm:$0xff] %v368_v28  ;;  %v137_v28 = vld [vmem:[#allocation6 + $0x2f0] sm:$0xff]  ;;  %v265_v33 = vmul.f32 %v678_v6, %v136_v25  ;;  %v392_v38 = vadd.f32 %v681_v9, %v263_v27 }
  0x5c   :  { %497 = vst [vmem:[#allocation7 + $0x220] sm:$0xff] %v369_v31  ;;  %v138_v31 = vld [vmem:[#allocation6 + $0x2f8] sm:$0xff]  ;;  %v266_v36 = vmul.f32 %v678_v6, %v137_v28  ;;  %v393_v41 = vadd.f32 %v681_v9, %v264_v30 }
  0x5d   :  { %498 = vst [vmem:[#allocation7 + $0x228] sm:$0xff] %v370_v34  ;;  %v139_v34 = vld [vmem:[#allocation6 + $0x300] sm:$0xff]  ;;  %v267_v39 = vmul.f32 %v678_v6, %v138_v31  ;;  %v394_v44 = vadd.f32 %v681_v9, %v265_v33 }
  0x5e   :  { %499 = vst [vmem:[#allocation7 + $0x230] sm:$0xff] %v371_v37  ;;  %v140_v37 = vld [vmem:[#allocation6 + $0x308] sm:$0xff]  ;;  %v268_v42 = vmul.f32 %v678_v6, %v139_v34  ;;  %v395_v47 = vadd.f32 %v681_v9, %v266_v36 }
  0x5f   :  { %500 = vst [vmem:[#allocation7 + $0x238] sm:$0xff] %v372_v40  ;;  %v141_v40 = vld [vmem:[#allocation6 + $0x310] sm:$0xff]  ;;  %v269_v45 = vmul.f32 %v678_v6, %v140_v37  ;;  %v396_v50 = vadd.f32 %v681_v9, %v267_v39 }
  0x60   :  { %501 = vst [vmem:[#allocation7 + $0x240] sm:$0xff] %v373_v43  ;;  %v142_v43 = vld [vmem:[#allocation6 + $0x318] sm:$0xff]  ;;  %v270_v48 = vmul.f32 %v678_v6, %v141_v40  ;;  %v397_v53 = vadd.f32 %v681_v9, %v268_v42 }
  0x61   :  { %502 = vst [vmem:[#allocation7 + $0x248] sm:$0xff] %v374_v46  ;;  %v143_v46 = vld [vmem:[#allocation6 + $0x320] sm:$0xff]  ;;  %v271_v51 = vmul.f32 %v678_v6, %v142_v43  ;;  %v398_v56 = vadd.f32 %v681_v9, %v269_v45 }
  0x62   :  { %503 = vst [vmem:[#allocation7 + $0x250] sm:$0xff] %v375_v49  ;;  %v144_v49 = vld [vmem:[#allocation6 + $0x328] sm:$0xff]  ;;  %v272_v54 = vmul.f32 %v678_v6, %v143_v46  ;;  %v399_v59 = vadd.f32 %v681_v9, %v270_v48 }
  0x63   :  { %504 = vst [vmem:[#allocation7 + $0x258] sm:$0xff] %v376_v52  ;;  %v145_v52 = vld [vmem:[#allocation6 + $0x330] sm:$0xff]  ;;  %v273_v57 = vmul.f32 %v678_v6, %v144_v49  ;;  %v400_v62 = vadd.f32 %v681_v9, %v271_v51 }
  0x64   :  { %505 = vst [vmem:[#allocation7 + $0x260] sm:$0xff] %v377_v55  ;;  %v146_v55 = vld [vmem:[#allocation6 + $0x338] sm:$0xff]  ;;  %v274_v60 = vmul.f32 %v678_v6, %v145_v52  ;;  %v401_v1 = vadd.f32 %v681_v9, %v272_v54 }
  0x65   :  { %506 = vst [vmem:[#allocation7 + $0x268] sm:$0xff] %v378_v58  ;;  %v147_v58 = vld [vmem:[#allocation6 + $0x340] sm:$0xff]  ;;  %v275_v63 = vmul.f32 %v678_v6, %v146_v55  ;;  %v402_v4 = vadd.f32 %v681_v9, %v273_v57 }
  0x66   :  { %507 = vst [vmem:[#allocation7 + $0x270] sm:$0xff] %v379_v61  ;;  %v148_v61 = vld [vmem:[#allocation6 + $0x348] sm:$0xff]  ;;  %v276_v2 = vmul.f32 %v678_v6, %v147_v58  ;;  %v403_v8 = vadd.f32 %v681_v9, %v274_v60 }
  0x67   :  { %508 = vst [vmem:[#allocation7 + $0x278] sm:$0xff] %v380_v0  ;;  %v149_v0 = vld [vmem:[#allocation6 + $0x350] sm:$0xff]  ;;  %v277_v5 = vmul.f32 %v678_v6, %v148_v61  ;;  %v404_v12 = vadd.f32 %v681_v9, %v275_v63 }
  0x68   :  { %509 = vst [vmem:[#allocation7 + $0x280] sm:$0xff] %v381_v3  ;;  %v150_v3 = vld [vmem:[#allocation6 + $0x358] sm:$0xff]  ;;  %v278_v10 = vmul.f32 %v678_v6, %v149_v0  ;;  %v405_v15 = vadd.f32 %v681_v9, %v276_v2 }
  0x69   :  { %510 = vst [vmem:[#allocation7 + $0x288] sm:$0xff] %v382_v7  ;;  %v151_v7 = vld [vmem:[#allocation6 + $0x360] sm:$0xff]  ;;  %v279_v13 = vmul.f32 %v678_v6, %v150_v3  ;;  %v406_v18 = vadd.f32 %v681_v9, %v277_v5 }
  0x6a   :  { %511 = vst [vmem:[#allocation7 + $0x290] sm:$0xff] %v383_v11  ;;  %v152_v11 = vld [vmem:[#allocation6 + $0x368] sm:$0xff]  ;;  %v280_v16 = vmul.f32 %v678_v6, %v151_v7  ;;  %v407_v21 = vadd.f32 %v681_v9, %v278_v10 }
  0x6b   :  { %512 = vst [vmem:[#allocation7 + $0x298] sm:$0xff] %v384_v14  ;;  %v153_v14 = vld [vmem:[#allocation6 + $0x370] sm:$0xff]  ;;  %v281_v19 = vmul.f32 %v678_v6, %v152_v11  ;;  %v408_v24 = vadd.f32 %v681_v9, %v279_v13 }
  0x6c   :  { %513 = vst [vmem:[#allocation7 + $0x2a0] sm:$0xff] %v385_v17  ;;  %v154_v17 = vld [vmem:[#allocation6 + $0x378] sm:$0xff]  ;;  %v282_v22 = vmul.f32 %v678_v6, %v153_v14  ;;  %v409_v27 = vadd.f32 %v681_v9, %v280_v16 }
  0x6d   :  { %514 = vst [vmem:[#allocation7 + $0x2a8] sm:$0xff] %v386_v20  ;;  %v155_v20 = vld [vmem:[#allocation6 + $0x380] sm:$0xff]  ;;  %v283_v25 = vmul.f32 %v678_v6, %v154_v17  ;;  %v410_v30 = vadd.f32 %v681_v9, %v281_v19 }
  0x6e   :  { %515 = vst [vmem:[#allocation7 + $0x2b0] sm:$0xff] %v387_v23  ;;  %v156_v23 = vld [vmem:[#allocation6 + $0x388] sm:$0xff]  ;;  %v284_v28 = vmul.f32 %v678_v6, %v155_v20  ;;  %v411_v33 = vadd.f32 %v681_v9, %v282_v22 }
  0x6f   :  { %516 = vst [vmem:[#allocation7 + $0x2b8] sm:$0xff] %v388_v26  ;;  %v157_v26 = vld [vmem:[#allocation6 + $0x390] sm:$0xff]  ;;  %v285_v31 = vmul.f32 %v678_v6, %v156_v23  ;;  %v412_v36 = vadd.f32 %v681_v9, %v283_v25 }
  0x70   :  { %517 = vst [vmem:[#allocation7 + $0x2c0] sm:$0xff] %v389_v29  ;;  %v158_v29 = vld [vmem:[#allocation6 + $0x398] sm:$0xff]  ;;  %v286_v34 = vmul.f32 %v678_v6, %v157_v26  ;;  %v413_v39 = vadd.f32 %v681_v9, %v284_v28 }
  0x71   :  { %518 = vst [vmem:[#allocation7 + $0x2c8] sm:$0xff] %v390_v32  ;;  %v159_v32 = vld [vmem:[#allocation6 + $0x3a0] sm:$0xff]  ;;  %v287_v37 = vmul.f32 %v678_v6, %v158_v29  ;;  %v414_v42 = vadd.f32 %v681_v9, %v285_v31 }
  0x72   :  { %519 = vst [vmem:[#allocation7 + $0x2d0] sm:$0xff] %v391_v35  ;;  %v160_v35 = vld [vmem:[#allocation6 + $0x3a8] sm:$0xff]  ;;  %v288_v40 = vmul.f32 %v678_v6, %v159_v32  ;;  %v415_v45 = vadd.f32 %v681_v9, %v286_v34 }
  0x73   :  { %520 = vst [vmem:[#allocation7 + $0x2d8] sm:$0xff] %v392_v38  ;;  %v161_v38 = vld [vmem:[#allocation6 + $0x3b0] sm:$0xff]  ;;  %v289_v43 = vmul.f32 %v678_v6, %v160_v35  ;;  %v416_v48 = vadd.f32 %v681_v9, %v287_v37 }
  0x74   :  { %521 = vst [vmem:[#allocation7 + $0x2e0] sm:$0xff] %v393_v41  ;;  %v162_v41 = vld [vmem:[#allocation6 + $0x3b8] sm:$0xff]  ;;  %v290_v46 = vmul.f32 %v678_v6, %v161_v38  ;;  %v417_v51 = vadd.f32 %v681_v9, %v288_v40 }
  0x75   :  { %522 = vst [vmem:[#allocation7 + $0x2e8] sm:$0xff] %v394_v44  ;;  %v163_v44 = vld [vmem:[#allocation6 + $0x3c0] sm:$0xff]  ;;  %v291_v49 = vmul.f32 %v678_v6, %v162_v41  ;;  %v418_v54 = vadd.f32 %v681_v9, %v289_v43 }
  0x76   :  { %523 = vst [vmem:[#allocation7 + $0x2f0] sm:$0xff] %v395_v47  ;;  %v164_v47 = vld [vmem:[#allocation6 + $0x3c8] sm:$0xff]  ;;  %v292_v52 = vmul.f32 %v678_v6, %v163_v44  ;;  %v419_v57 = vadd.f32 %v681_v9, %v290_v46 }
  0x77   :  { %524 = vst [vmem:[#allocation7 + $0x2f8] sm:$0xff] %v396_v50  ;;  %v165_v50 = vld [vmem:[#allocation6 + $0x3d0] sm:$0xff]  ;;  %v293_v55 = vmul.f32 %v678_v6, %v164_v47  ;;  %v420_v60 = vadd.f32 %v681_v9, %v291_v49 }
  0x78   :  { %525 = vst [vmem:[#allocation7 + $0x300] sm:$0xff] %v397_v53  ;;  %v166_v53 = vld [vmem:[#allocation6 + $0x3d8] sm:$0xff]  ;;  %v294_v58 = vmul.f32 %v678_v6, %v165_v50  ;;  %v421_v63 = vadd.f32 %v681_v9, %v292_v52 }
  0x79   :  { %526 = vst [vmem:[#allocation7 + $0x308] sm:$0xff] %v398_v56  ;;  %v167_v56 = vld [vmem:[#allocation6 + $0x3e0] sm:$0xff]  ;;  %v295_v61 = vmul.f32 %v678_v6, %v166_v53  ;;  %v422_v2 = vadd.f32 %v681_v9, %v293_v55 }
  0x7a   :  { %527 = vst [vmem:[#allocation7 + $0x310] sm:$0xff] %v399_v59  ;;  %v168_v59 = vld [vmem:[#allocation6 + $0x3e8] sm:$0xff]  ;;  %v296_v0 = vmul.f32 %v678_v6, %v167_v56 }
  0x7b   :  { %528 = vst [vmem:[#allocation7 + $0x318] sm:$0xff] %v400_v62  ;;  %v169_v62 = vld [vmem:[#allocation6 + $0x3f0] sm:$0xff]  ;;  %v297_v3 = vmul.f32 %v678_v6, %v168_v59  ;;  %v424_v7 = vadd.f32 %v681_v9, %v295_v61 }
  0x7c   :  { %529 = vst [vmem:[#allocation7 + $0x320] sm:$0xff] %v401_v1  ;;  %v170_v1 = vld [vmem:[#allocation6 + $0x3f8] sm:$0xff]  ;;  %v298_v5 = vmul.f32 %v678_v6, %v169_v62  ;;  %v425_v10 = vadd.f32 %v681_v9, %v296_v0 }
  0x7d   :  { %530 = vst [vmem:[#allocation7 + $0x328] sm:$0xff] %v402_v4  ;;  %v423_v4 = vadd.f32 %v681_v9, %v294_v58  ;;  %v426_v11 = vadd.f32 %v681_v9, %v297_v3 }
  0x7e   :  { %531 = vst [vmem:[#allocation7 + $0x330] sm:$0xff] %v403_v8  ;;  %v299_v8 = vmul.f32 %v678_v6, %v170_v1 }
  0x7f   :  { %532 = vst [vmem:[#allocation7 + $0x338] sm:$0xff] %v404_v12  ;;  %v427_v12 = vadd.f32 %v681_v9, %v298_v5 }
  0x80   :  { %533 = vst [vmem:[#allocation7 + $0x340] sm:$0xff] %v405_v15  ;;  %v428_v13 = vadd.f32 %v681_v9, %v299_v8 }
  0x81   :  { %534 = vst [vmem:[#allocation7 + $0x348] sm:$0xff] %v406_v18 }
  0x82   :  { %535 = vst [vmem:[#allocation7 + $0x350] sm:$0xff] %v407_v21 }
  0x83   :  { %536 = vst [vmem:[#allocation7 + $0x358] sm:$0xff] %v408_v24 }
  0x84   :  { %537 = vst [vmem:[#allocation7 + $0x360] sm:$0xff] %v409_v27 }
  0x85   :  { %538 = vst [vmem:[#allocation7 + $0x368] sm:$0xff] %v410_v30 }
  0x86   :  { %539 = vst [vmem:[#allocation7 + $0x370] sm:$0xff] %v411_v33 }
  0x87   :  { %540 = vst [vmem:[#allocation7 + $0x378] sm:$0xff] %v412_v36 }
  0x88   :  { %541 = vst [vmem:[#allocation7 + $0x380] sm:$0xff] %v413_v39 }
  0x89   :  { %542 = vst [vmem:[#allocation7 + $0x388] sm:$0xff] %v414_v42 }
  0x8a   :  { %543 = vst [vmem:[#allocation7 + $0x390] sm:$0xff] %v415_v45 }
  0x8b   :  { %544 = vst [vmem:[#allocation7 + $0x398] sm:$0xff] %v416_v48 }
  0x8c   :  { %545 = vst [vmem:[#allocation7 + $0x3a0] sm:$0xff] %v417_v51 }
  0x8d   :  { %546 = vst [vmem:[#allocation7 + $0x3a8] sm:$0xff] %v418_v54 }
  0x8e   :  { %547 = vst [vmem:[#allocation7 + $0x3b0] sm:$0xff] %v419_v57 }
  0x8f   :  { %548 = vst [vmem:[#allocation7 + $0x3b8] sm:$0xff] %v420_v60 }
  0x90   :  { %549 = vst [vmem:[#allocation7 + $0x3c0] sm:$0xff] %v421_v63 }
  0x91   :  { %550 = vst [vmem:[#allocation7 + $0x3c8] sm:$0xff] %v422_v2 }
  0x92   :  { %551 = vst [vmem:[#allocation7 + $0x3d0] sm:$0xff] %v423_v4 }
  0x93   :  { %552 = vst [vmem:[#allocation7 + $0x3d8] sm:$0xff] %v424_v7 }
  0x94   :  { %553 = vst [vmem:[#allocation7 + $0x3e0] sm:$0xff] %v425_v10 }
  0x95   :  { %554 = vst [vmem:[#allocation7 + $0x3e8] sm:$0xff] %v426_v11 }
  0x96   :  { %555 = vst [vmem:[#allocation7 + $0x3f0] sm:$0xff] %v427_v12 }
  0x97   :  { %556 = vst [vmem:[#allocation7 + $0x3f8] sm:$0xff] %v428_v13 }
  0x98   :  { %569 = dma.vmem_to_hbm [thread:$0]  %s562_s21, 16384, %s564_s24, [#allocation4], %s651_s18, %s651_s18, %s652_s19  }
  0x99   :  { %647 = dma.done.wait [#allocation4], 16384  }
  0x9a   :  { %648 = vsyncadd [#allocation4], 4294950912 }
  0x9b   :  { %574 = vsyncpa [#allocation3], 1 }
  0x9c   :  { %575 = vsyncpa [#allocation4], 1 }
  0x9d   :  { %576 = vsyncpa [#allocation5], 1 }

</bundles_post_ra>
